<compile_context>
chip_gen: v7x
topology: tpu7x:2x2x1
jax: 0.10.0
libtpu: 0.0.40
codegen_flags: <defaults>
</compile_context>

<pallas_src>
import functools

import jax
import jax.numpy as jnp
from jax import lax
from jax.experimental import pallas as pl
from jax.experimental.pallas import tpu as pltpu


def _label_smoothing_kernel(x_ref, tgt_ref, out_ref, *, confidence, smoothing,
                            batch, needs_mask):
    tile_b, num_classes = x_ref.shape
    uniform_w = smoothing / num_classes

    # Row max in the native dtype (exact for bf16/f32); only the (tile_b, 1)
    # result is upcast.
    m = jnp.max(x_ref[...], axis=-1, keepdims=True).astype(jnp.float32)

    # exp-sum pass; cast inline so bf16 inputs never materialize an f32 tile.
    lse = jnp.log(jnp.sum(jnp.exp(x_ref[...].astype(jnp.float32) - m),
                          axis=-1, keepdims=True))

    # Fused gather + mean: one weighted reduction replaces the separate
    # masked-gather sum and sum(x)/C passes.
    tgt = tgt_ref[...]                                           # (tile_b, 1) int32
    col = lax.broadcasted_iota(jnp.int32, (tile_b, num_classes), 1)
    w = jnp.where(col == tgt,
                  jnp.float32(confidence + uniform_w),
                  jnp.float32(uniform_w))
    lin = jnp.sum(w * x_ref[...].astype(jnp.float32), axis=-1, keepdims=True)

    loss = jnp.float32(confidence + smoothing) * (m + lse) - lin  # (tile_b, 1)

    if needs_mask:
        # Tail tile may read out-of-bounds (garbage) rows; all reductions above
        # are per-row, so garbage never crosses rows -- just select 0 here.
        row = (pl.program_id(0) * tile_b
               + lax.broadcasted_iota(jnp.int32, (tile_b, 1), 0))
        loss = jnp.where(row < batch, loss, jnp.float32(0.0))

    out_ref[...] = loss


def _pick_tile_b(batch, num_classes, itemsize,
                 target_block_bytes=8 << 20, vmem_budget_bytes=20 << 20):
    """Largest multiple-of-8 row tile whose working set fits the VMEM budget,
    capped so the grid has >= 4 steps when the batch allows it."""
    if batch <= 8:
        return batch                       # full-array block is always legal
    # Per-row VMEM bytes: double-buffered x block, headroom for f32 elementwise
    # temps (exp / weights), and the lane-padded target + output columns.
    per_row = (2 * num_classes * itemsize        # x block, 2 buffers
               + 2 * num_classes * 4             # f32 temp headroom
               + 2 * 128 * 4                     # target column (padded lanes), 2 buffers
               + 2 * 128 * 4)                    # output column, 2 buffers
    rows_budget = vmem_budget_bytes // per_row
    rows_target = target_block_bytes // max(1, num_classes * itemsize)
    tile_b = min(rows_budget, rows_target, (batch // 8) * 8)
    if batch >= 32:
        tile_b = min(tile_b, batch // 4)         # >= 4 grid steps
    return max(8, (tile_b // 8) * 8)


def label_smoothing_loss(x, target, smoothing=0.0, *, tile_b=None):
    """Pallas TPU implementation of LabelSmoothing.forward(x, target)."""
    B, C = x.shape
    confidence = 1.0 - smoothing

    if tile_b is None:
        tile_b = _pick_tile_b(B, C, x.dtype.itemsize)
    assert tile_b == B or tile_b % 8 == 0, (B, tile_b)

    num_tiles = pl.cdiv(B, tile_b)
    b_pad = num_tiles * tile_b

    tgt = target.astype(jnp.int32)
    if b_pad != B:
        tgt = jnp.pad(tgt, (0, b_pad - B))       # padded rows masked in-kernel
    tgt2d = tgt.reshape(b_pad, 1)

    kernel = functools.partial(
        _label_smoothing_kernel,
        confidence=float(confidence),
        smoothing=float(smoothing),
        batch=B,
        needs_mask=(b_pad != B),
    )

    cost = pl.CostEstimate(
        flops=6 * B * C,                    # max / sub / select / mul / 2 row-sums
        transcendentals=B * C + B,          # exp over the tile + log per row
        bytes_accessed=B * C * x.dtype.itemsize + b_pad * 4 + b_pad * 4,
    )

    per_row = pl.pallas_call(
        kernel,
        out_shape=jax.ShapeDtypeStruct((b_pad, 1), jnp.float32),
        grid_spec=pltpu.PrefetchScalarGridSpec(
            num_scalar_prefetch=0,
            grid=(num_tiles,),
            in_specs=[
                pl.BlockSpec((tile_b, C), lambda i: (i, 0)),
                pl.BlockSpec((tile_b, 1), lambda i: (i, 0)),
            ],
            out_specs=pl.BlockSpec((tile_b, 1), lambda i: (i, 0)),
        ),
        compiler_params=pltpu.CompilerParams(
            dimension_semantics=("parallel",),
            # v5e's default scoped VMEM is 16 MiB; raise it explicitly so the
            # ~8 MiB double-buffered blocks fit on all of v5e / v6e / v7x.
            vmem_limit_bytes=32 * 1024 * 1024,
        ),
        cost_estimate=cost,
    )(x, tgt2d)

    # Padded rows are written as exactly 0, so a plain sum / true-B is the mean.
    return jnp.sum(per_row) / jnp.float32(B)


def _reference(x, target, smoothing):
    confidence = 1.0 - smoothing
    logprobs = jax.nn.log_softmax(x.astype(jnp.float32), axis=-1)
    nll = -jnp.take_along_axis(logprobs, target[:, None], axis=-1)[:, 0]
    smooth = -jnp.mean(logprobs, axis=-1)
    return jnp.mean(confidence * nll + smoothing * smooth)


if __name__ == "__main__":
    key = jax.random.PRNGKey(0)
    kx, kt = jax.random.split(key)
    smoothing = 0.1

    # Divisible batch: auto-tiler picks tile_b=16 -> 4 parallel grid steps.
    B, C = 64, 128
    x = jax.random.normal(kx, (B, C), dtype=jnp.float32)
    target = jax.random.randint(kt, (B,), 0, C, dtype=jnp.int32)

    loss = jax.block_until_ready(label_smoothing_loss(x, target, smoothing=smoothing))
    ref = _reference(x, target, smoothing)
    assert jnp.allclose(loss, ref, atol=1e-5, rtol=1e-5), (loss, ref)

    # Explicit tile override (still divisible) exercises a different grid.
    loss_t = jax.block_until_ready(
        label_smoothing_loss(x, target, smoothing=smoothing, tile_b=32))
    assert jnp.allclose(loss_t, ref, atol=1e-5, rtol=1e-5), (loss_t, ref)

    # Ragged batch (not a multiple of 8) exercises cdiv grid + tail masking.
    B2 = 50
    x2, t2 = x[:B2], target[:B2]
    loss2 = jax.block_until_ready(label_smoothing_loss(x2, t2, smoothing=smoothing))
    ref2 = _reference(x2, t2, smoothing)
    assert jnp.allclose(loss2, ref2, atol=1e-5, rtol=1e-5), (loss2, ref2)

    print("KERNEL_OK")
</pallas_src>

<mosaic_0001>
module attributes {stable_mosaic.version = 11 : i64} {
  func.func @_label_smoothing_kernel(%arg0: i32, %arg1: memref<16x128xf32, #tpu.memory_space<vmem>>, %arg2: memref<16x1xi32, #tpu.memory_space<vmem>>, %arg3: memref<16x1xf32, #tpu.memory_space<vmem>>) attributes {dimension_semantics = [#tpu.dimension_semantics<parallel>], iteration_bounds = array<i64: 4>, scalar_prefetch = 0 : i64, scratch_operands = 0 : i64, tpu.core_type = #tpu.core_type<tc>, window_params = [{transform_indices = @transform_0, window_bounds = array<i64: 16, 128>}, {transform_indices = @transform_1, window_bounds = array<i64: 16, 1>}, {transform_indices = @transform_2, window_bounds = array<i64: 16, 1>}]} {
    %c0 = arith.constant 0 : index
    %c0_0 = arith.constant 0 : index
    %0 = vector.load %arg1[%c0, %c0_0] : memref<16x128xf32, #tpu.memory_space<vmem>>, vector<16x128xf32>
    %cst = arith.constant dense<0xFF800000> : vector<16xf32>
    %1 = vector.multi_reduction <maximumf>, %0, %cst [1] : vector<16x128xf32> to vector<16xf32>
    %2 = vector.shape_cast %1 : vector<16xf32> to vector<16x1xf32>
    %c0_1 = arith.constant 0 : index
    %c0_2 = arith.constant 0 : index
    %3 = vector.load %arg1[%c0_1, %c0_2] : memref<16x128xf32, #tpu.memory_space<vmem>>, vector<16x128xf32>
    %4 = vector.broadcast %2 : vector<16x1xf32> to vector<16x128xf32>
    %5 = arith.subf %3, %4 : vector<16x128xf32>
    %6 = math.exp %5 : vector<16x128xf32>
    %cst_3 = arith.constant dense<0.000000e+00> : vector<16xf32>
    %7 = vector.multi_reduction <add>, %6, %cst_3 [1] : vector<16x128xf32> to vector<16xf32>
    %8 = vector.shape_cast %7 : vector<16xf32> to vector<16x1xf32>
    %9 = math.log %8 : vector<16x1xf32>
    %c0_4 = arith.constant 0 : index
    %c0_5 = arith.constant 0 : index
    %10 = vector.load %arg2[%c0_4, %c0_5] : memref<16x1xi32, #tpu.memory_space<vmem>>, vector<16x1xi32>
    %11 = tpu.iota {dimensions = array<i32: 1>} : vector<16x128xi32>
    %12 = vector.broadcast %10 : vector<16x1xi32> to vector<16x128xi32>
    %13 = arith.cmpi eq, %11, %12 : vector<16x128xi32>
    %cst_6 = arith.constant 0.900781273 : f32
    %cst_7 = arith.constant 7.812500e-04 : f32
    %14 = vector.broadcast %cst_6 : f32 to vector<16x128xf32>
    %15 = vector.broadcast %cst_7 : f32 to vector<16x128xf32>
    %16 = arith.select %13, %14, %15 : vector<16x128xi1>, vector<16x128xf32>
    %c0_8 = arith.constant 0 : index
    %c0_9 = arith.constant 0 : index
    %17 = vector.load %arg1[%c0_8, %c0_9] : memref<16x128xf32, #tpu.memory_space<vmem>>, vector<16x128xf32>
    %18 = arith.mulf %16, %17 : vector<16x128xf32>
    %cst_10 = arith.constant dense<0.000000e+00> : vector<16xf32>
    %19 = vector.multi_reduction <add>, %18, %cst_10 [1] : vector<16x128xf32> to vector<16xf32>
    %20 = vector.shape_cast %19 : vector<16xf32> to vector<16x1xf32>
    %21 = arith.addf %2, %9 : vector<16x1xf32>
    %cst_11 = arith.constant 1.000000e+00 : f32
    %22 = vector.broadcast %cst_11 : f32 to vector<16x1xf32>
    %23 = arith.mulf %22, %21 : vector<16x1xf32>
    %24 = arith.subf %23, %20 : vector<16x1xf32>
    %c0_12 = arith.constant 0 : index
    %c0_13 = arith.constant 0 : index
    %25 = vector.load %arg3[%c0_12, %c0_13] : memref<16x1xf32, #tpu.memory_space<vmem>>, vector<16x1xf32>
    tpu.vector_store %arg3[%c0_12, %c0_13], %24 {strides = array<i32>} : memref<16x1xf32, #tpu.memory_space<vmem>>, vector<16x1xf32>,
    return
  }
  func.func @transform_0(%arg0: i32) -> (i32, i32) {
    %c0_i32 = arith.constant 0 : i32
    %c0_i32_0 = arith.constant 0 : i32
    return %arg0, %c0_i32 : i32, i32
  }
  func.func @transform_1(%arg0: i32) -> (i32, i32) {
    %c0_i32 = arith.constant 0 : i32
    %c0_i32_0 = arith.constant 0 : i32
    return %arg0, %c0_i32 : i32, i32
  }
  func.func @transform_2(%arg0: i32) -> (i32, i32) {
    %c0_i32 = arith.constant 0 : i32
    %c0_i32_0 = arith.constant 0 : i32
    return %arg0, %c0_i32 : i32, i32
  }
}

</mosaic_0001>

<bundles_post_ra>
// kernel: tpu_custom_call.1
= control target key start
LH: loop header
LB: loop body
LE: loop exit
PB: predicated region body
PF: predicated region fallthrough
CT: control target
= control target key end

     0   :  { %s342_s9 = smov 0   ;;  %s367_s0 = inlined_call_operand.vmem [shape: f32[64,128], index: 0, kind: input, shape index: {}]   ;;  %s368_s1 = inlined_call_operand.vmem [shape: s32[64,1], index: 1, kind: input, shape index: {}]   ;;  %s369_s2 = inlined_call_operand.vmem [shape: f32[64,1], index: 2, kind: output, shape index: {}]  }
   0x1 LB: > { %s284_s10 = sadd.s32 4294967295, %s323_s9   ;;  %p288_p0 = scmp.ge.s32.totalorder %s323_s9, 1  ;;  %s323_s9 = sphi %s342_s9, %s12_s9  }
   0x2   : > { %p124_p1 = scmp.lt.s32.totalorder %s323_s9, 5 }
   0x4   : > { %p125_p2 = pnand %p288_p0, %p124_p1 }
   0x5   : > { %s289_s11 = sshll.u32 (!%p125_p2), %s284_s10, 1  ;;  %v325_v0 = vmov (!%p125_p2), 0   ;;  %v191_v7 = vlaneseq (!%p125_p2)  ;;  %v326_v15 = vmov (!%p125_p2), 0.00078125   ;;  %vm213_vm2 = vcmask (!%p125_p2), 7168  }
   0x6   : > { %128 = sbr.rel (%p125_p2) target bundleno = 338 (0x152), region = 28  ;;  %p152_p3 = scmp.lt.s32.totalorder (!%p125_p2), %s289_s11, 7  ;;  %307 = vset.pattern.permute.xlu1 (!%p125_p2), %v325_v0  ;;  %308 = vset.pattern.permute.xlu0 (!%p125_p2), %v325_v0 }
   0x7   : > { %v192_v12 = vand.u32 (!%p125_p2), 127, %v191_v7 }
   0xd   : > { %s371_s11 = smov (!%p152_p3, %s289_s11), 7 }
   0xe   : > { %s350_s12 = sshll.u32 %s371_s11, 3 }
   0xf   : > { %s155_s15 = scalar_lea.vmem %s367_s0, %s350_s12  ;;  %s161_s18 = scalar_lea.vmem %s368_s1, %s350_s12 }
  0x10   : > { %v169_v1 = vld [vmem:[%s155_s15] sm:$0xff]  ;;  %v170_v3 = vld [vmem:[%s155_s15 + $0x8] sm:$0xff]  ;;  %s167_s21 = scalar_lea.vmem %s369_s2, %s350_s12 }
  0x11   : > { %v189_v2 = vld [vmem:[%s161_s18] sm:$0xff]  ;;  %171 = vmax.xlane.f32.xlu0 %v169_v1  ;;  %v190_v4 = vld [vmem:[%s161_s18 + $0x8] sm:$0xff] }
  0x12   : > { %194 = vperm.xlu1 %307, %v189_v2  }
  0x15   : > { %173 = vmax.xlane.f32.xlu0 %v170_v3 }
  0x16   : > { %197 = vperm.xlu1 %307, %v190_v4  }
  0x91   : > { %v195_v11 = vpop.permute.xlu1 %194 }
  0x92   : > { %vm199_vm0 = vcmp.eq.s32.totalorder %v192_v12, %v195_v11 }
  0x93   : > { %v201_v16 = vsel %vm199_vm0, 0.9007813, %v326_v15 }
  0x94   : > { %v203_v18 = vmul.f32 %v201_v16, %v169_v1 }
  0x95   : > { %v198_v14 = vpop.permute.xlu1 %197 }
  0x96   : > { %vm200_vm1 = vcmp.eq.s32.totalorder %v192_v12, %v198_v14 }
  0x97   : > { %v202_v19 = vsel %vm200_vm1, 0.9007813, %v326_v15 }
  0x98   : > { %v204_v21 = vmul.f32 %v202_v19, %v170_v3 }
  0x9e   : > { %v172_v5 = vpop.xlane.xlu0 %171 }
  0x9f   : > { %v175_v6 = vsub.f32 %v169_v1, %v172_v5 }
  0xa1   : > { %v177_v8 = vmul.f32 1.442695, %v175_v6 }
  0xa2   : > { %v174_v9 = vpop.xlane.xlu0 %173 }
  0xa3   : > { %309 = vpow2.f32 %v177_v8  ;;  %v176_v10 = vsub.f32 %v170_v3, %v174_v9 }
  0xa5   : > { %v179_v13 = vmul.f32 1.442695, %v176_v10 }
  0xa7   : > { %311 = vpow2.f32 %v179_v13 }
  0xad   : > { %v310_v17 = vpop.eup %309 }
  0xae   : > { %181 = vadd.xlane.f32.xlu0 %v310_v17 }
  0xb1   : > { %v312_v20 = vpop.eup %311 }
  0xb2   : > { %183 = vadd.xlane.f32.xlu1 %v312_v20  ;;  %205 = vadd.xlane.f32.xlu0 %v203_v18 }
  0xb6   : > { %207 = vadd.xlane.f32.xlu0 %v204_v21 }
 0x13b   : > { %v182_v22 = vpop.xlane.xlu0 %181 }
 0x13c   : > { %313 = vlog2.f32 %v182_v22 }
 0x13f   : > { %v184_v23 = vpop.xlane.xlu1 %183  ;;  %v206_v26 = vpop.xlane.xlu0 %205 }
 0x140   : > { %315 = vlog2.f32 %v184_v23 }
 0x143   : > { %v208_v32 = vpop.xlane.xlu0 %207 }
 0x146   : > { %v314_v24 = vpop.eup %313 }
 0x147   : > { %v186_v25 = vmul.f32 0.6931472, %v314_v24 }
 0x149   : > { %v209_v27 = vadd.f32 %v186_v25, %v172_v5 }
 0x14a   : > { %v316_v28 = vpop.eup %315 }
 0x14b   : > { %v188_v29 = vmul.f32 0.6931472, %v316_v28  ;;  %v211_v30 = vsub.f32 %v209_v27, %v206_v26 }
 0x14d   : > { %214 = vst.msk [vmem:[%s167_s21] sm:$0xff] %vm213_vm2, %v211_v30  ;;  %v210_v31 = vadd.f32 %v188_v29, %v174_v9 }
 0x14f   : > { %v212_v33 = vsub.f32 %v210_v31, %v208_v32 }
 0x151   : > { %215 = vst.msk [vmem:[%s167_s21 + $0x8] sm:$0xff] %vm213_vm2, %v212_v33 }
 0x152 PF: > { %s12_s9 = sadd.s32 1, %s323_s9  }
 0x153   : > { %p9_p4 = scmp.ge.s32.totalorder %s12_s9, 6  }
 0x155   :  { %11 = sbr.rel (!%p9_p4) target bundleno = 1 (0x1), region = 61 }

</bundles_post_ra>
